<compile_context>
chip_gen: v5e
topology: v5e:2x2
jax: 0.10.0
libtpu: 0.0.40
codegen_flags: <defaults>
</compile_context>

<pallas_src>
import jax
import jax.numpy as jnp
from jax.experimental import pallas as pl
from jax.experimental.pallas import tpu as pltpu


# ---------------------------------------------------------------------------
# Kernel
# ---------------------------------------------------------------------------
def _mha_head_kernel(x_ref, wqkv_ref, wp_ref, o_ref, acc_ref):
    """One grid step = (one batch block, one attention head).

    Grid: (B // block_b, num_heads); the head axis is a reduction that
    accumulates each head's contribution to the output projection into a
    float32 VMEM scratch.
    """
    h = pl.program_id(1)

    @pl.when(h == 0)
    def _init():
        acc_ref[...] = jnp.zeros_like(acc_ref)

    block_b, T, C = x_ref.shape
    head_dim = wp_ref.shape[1]
    out_dim = wp_ref.shape[2]
    cdt = x_ref.dtype                       # compute dtype (matmul boundaries)

    x2d = x_ref[...].reshape(block_b * T, C)

    # Per-head Q/K/V projections. The softmax scale is pre-folded into the Q
    # weight (wrapper), so there is no in-kernel score multiply. f32 MXU acc.
    q = jnp.dot(x2d, wqkv_ref[0, 0], preferred_element_type=jnp.float32)
    k = jnp.dot(x2d, wqkv_ref[0, 1], preferred_element_type=jnp.float32)
    v = jnp.dot(x2d, wqkv_ref[0, 2], preferred_element_type=jnp.float32)

    q3 = q.astype(cdt).reshape(block_b, T, head_dim)
    k3 = k.astype(cdt).reshape(block_b, T, head_dim)
    v3 = v.astype(cdt).reshape(block_b, T, head_dim)

    # Scaled-dot-product attention batched over the batch block (single batch
    # dim -> clean Mosaic lowering; no per-head loop, no lane slicing).
    # TODO(synk): for long T, tile KV into the grid with an online
    # (flash-style) softmax instead of materializing (block_b, T, T) scores.
    scores = jnp.einsum('bqd,bkd->bqk', q3, k3,
                        preferred_element_type=jnp.float32)
    m = jnp.max(scores, axis=-1, keepdims=True)
    e = jnp.exp(scores - m)
    denom = jnp.sum(e, axis=-1, keepdims=True)
    # Exact reciprocal: only touches a (block_b, T, 1) tensor; keeps the
    # result numerically close to the PyTorch reference (per review).
    probs = (e * (1.0 / denom)).astype(cdt)

    ctx = jnp.einsum('bqk,bkd->bqd', probs, v3,
                     preferred_element_type=jnp.float32)
    ctx2d = ctx.reshape(block_b * T, head_dim).astype(cdt)

    # Head-h rows of the output projection; summing over heads reproduces the
    # concat-then-project of the reference. Output scale pre-folded into Wp.
    acc_ref[...] += jnp.dot(ctx2d, wp_ref[0],
                            preferred_element_type=jnp.float32)

    @pl.when(h == pl.num_programs(1) - 1)
    def _finalize():
        o_ref[...] = acc_ref[...].reshape(block_b, T, out_dim).astype(o_ref.dtype)


# ---------------------------------------------------------------------------
# One-time weight preparation (hoisted out of the per-call path)
# ---------------------------------------------------------------------------
def prepare_attention_weights(wq, wk, wv, wp, *, num_heads,
                              compute_dtype=jnp.bfloat16):
    """Fold scales, re-lay weights per head, and (optionally) cast to bf16.

    Returned layouts:
      w_qkv : (num_heads, 3, C, head_dim)    x @ w_qkv[h, i] == head-h q/k/v
      wp    : (num_heads, head_dim, out_dim_padded)
    """
    inner_dim, input_dim = wq.shape
    out_dim = wp.shape[0]
    assert wp.shape[1] == inner_dim
    assert inner_dim % num_heads == 0
    head_dim = inner_dim // num_heads

    # Fold all scalar scales in f32, *before* any low-precision cast:
    #   q,k each carry C^-0.5 and scores carry Dh^-0.5 -> Q weight gets
    #   C^-1 * Dh^-0.5;  v carries C^-0.5 and the projection carries
    #   inner_dim^-0.5 -> the projection weight gets C^-0.5 * inner_dim^-0.5.
    score_scale = (1.0 / input_dim) * head_dim ** -0.5
    out_scale = input_dim ** -0.5 * inner_dim ** -0.5

    wq32 = wq.astype(jnp.float32) * score_scale
    wk32 = wk.astype(jnp.float32)
    wv32 = wv.astype(jnp.float32)
    wp32 = wp.astype(jnp.float32) * out_scale

    def per_head(w):                        # (inner, C) -> (H, C, head_dim)
        return w.reshape(num_heads, head_dim, input_dim).transpose(0, 2, 1)

    w_qkv = jnp.stack([per_head(wq32), per_head(wk32), per_head(wv32)],
                      axis=1)                           # (H, 3, C, head_dim)
    wp_head = wp32.T.reshape(num_heads, head_dim, out_dim)

    # Lane-dense output only when padding overhead is small; for narrow
    # out_dim a masked store beats write amplification + a re-slice.
    out_dim_p = out_dim
    if out_dim >= 128 and out_dim % 128 != 0:
        out_dim_p = pl.cdiv(out_dim, 128) * 128
        wp_head = jnp.pad(wp_head, ((0, 0), (0, 0), (0, out_dim_p - out_dim)))

    if compute_dtype is not None:
        w_qkv = w_qkv.astype(compute_dtype)
        wp_head = wp_head.astype(compute_dtype)

    return {"w_qkv": w_qkv, "wp": wp_head, "out_dim": out_dim,
            "num_heads": num_heads, "head_dim": head_dim,
            "input_dim": input_dim}


# ---------------------------------------------------------------------------
# VMEM-aware sizing helpers
# ---------------------------------------------------------------------------
def _vmem_capacity_bytes():
    try:
        info = pltpu.get_tpu_info()
        for name in ("vmem_capacity_bytes", "vmem_size_bytes", "vmem_bytes"):
            cap = getattr(info, name, None)
            if cap:
                return int(cap)
    except Exception:
        pass
    return 64 * 1024 * 1024          # conservative default: v7x per-TC VMEM


def _step_vmem_bytes(bb, T, C, head_dim, out_dim_p, out_isz, cm_isz):
    rows = bb * T
    total = 0
    total += 2 * rows * C * cm_isz               # x block (double-buffered)
    total += 2 * rows * out_dim_p * out_isz      # output block
    total += 2 * 3 * C * head_dim * cm_isz       # per-head QKV weight block
    total += 2 * head_dim * out_dim_p * cm_isz   # per-head projection rows
    total += rows * out_dim_p * 4                # f32 accumulator scratch
    total += 4 * rows * head_dim * 4             # q/k/v/ctx f32 intermediates
    total += 3 * bb * T * T * 4                  # scores / exp / probs
    return total


def _pick_block_b(B, T, C, head_dim, out_dim_p, out_isz, cm_isz, budget):
    divisors = [d for d in range(1, B + 1) if B % d == 0]
    fitting = [d for d in divisors
               if _step_vmem_bytes(d, T, C, head_dim, out_dim_p,
                                   out_isz, cm_isz) <= budget] or [1]
    # Prefer >= 2 batch blocks so the "parallel" grid axis can shard across
    # v7x's two TensorCores (no effect on single-TC v5e/v6e).
    pool = [d for d in fitting if B // d >= 2] or fitting
    for d in pool:                   # smallest block reaching ~512 MXU rows
        if d * T >= 512:
            return d
    return pool[-1]                  # otherwise the largest fitting block


# ---------------------------------------------------------------------------
# Wrapper
# ---------------------------------------------------------------------------
def attention_block(x, params, *, block_b=None):
    """x: (B, T, C); params from prepare_attention_weights().

    Returns (B, T, out_dim) in x's dtype.
    """
    w_qkv, wp_head = params["w_qkv"], params["wp"]
    num_heads, _, C, head_dim = w_qkv.shape
    out_dim_p = wp_head.shape[-1]
    out_dim = params["out_dim"]

    B, T, C_in = x.shape
    assert C_in == C, "embedding dim mismatch"
    out_dtype = x.dtype
    x_c = x.astype(w_qkv.dtype)           # bf16 only at matmul boundaries

    capacity = _vmem_capacity_bytes()
    cm_isz = jnp.dtype(w_qkv.dtype).itemsize
    out_isz = jnp.dtype(out_dtype).itemsize
    if block_b is None:
        block_b = _pick_block_b(B, T, C, head_dim, out_dim_p,
                                out_isz, cm_isz, budget=capacity // 2)
    assert B % block_b == 0, "block_b must divide the batch size"

    out_p = pl.pallas_call(
        _mha_head_kernel,
        out_shape=jax.ShapeDtypeStruct((B, T, out_dim_p), out_dtype),
        grid_spec=pltpu.PrefetchScalarGridSpec(
            num_scalar_prefetch=0,
            grid=(B // block_b, num_heads),        # reduction (heads) last
            in_specs=[
                pl.BlockSpec((block_b, T, C), lambda b, h: (b, 0, 0)),
                pl.BlockSpec((1, 3, C, head_dim), lambda b, h: (h, 0, 0, 0)),
                pl.BlockSpec((1, head_dim, out_dim_p), lambda b, h: (h, 0, 0)),
            ],
            out_specs=pl.BlockSpec((block_b, T, out_dim_p),
                                   lambda b, h: (b, 0, 0)),
            scratch_shapes=[pltpu.VMEM((block_b * T, out_dim_p), jnp.float32)],
        ),
        compiler_params=pltpu.CompilerParams(
            dimension_semantics=("parallel", "arbitrary"),
            vmem_limit_bytes=int(capacity * 3 // 4),
        ),
    )(x_c, w_qkv, wp_head)

    if out_dim_p != out_dim:
        # TODO(synk): hand the padded (B, T, out_dim_p) buffer to the consumer
        # instead of this extra HBM read+write slice (per perf review).
        return out_p[..., :out_dim]
    return out_p


# ---------------------------------------------------------------------------
# Pure-JAX reference (mirrors the PyTorch forward exactly)
# ---------------------------------------------------------------------------
def attention_block_ref(x, wq, wk, wv, wp, *, num_heads):
    B, T, C = x.shape
    inner_dim = wq.shape[0]
    head_dim = inner_dim // num_heads
    c_scale = C ** (-0.5)

    def heads(w):
        y = (x @ w.T) * c_scale
        return y.reshape(B, T, num_heads, head_dim).transpose(0, 2, 1, 3)

    q, k, v = heads(wq), heads(wk), heads(wv)
    weight = jnp.einsum('bhtd,bhsd->bhts', q, k) * head_dim ** (-0.5)
    weight = jax.nn.softmax(weight, axis=-1)
    out = jnp.einsum('bhts,bhsd->bhtd', weight, v)
    out = out.transpose(0, 2, 1, 3).reshape(B, T, inner_dim)
    return (out @ wp.T) * inner_dim ** (-0.5)


# ---------------------------------------------------------------------------
# Self-test
# ---------------------------------------------------------------------------
if __name__ == "__main__":
    # AttentionBlock(embedding_dim=32, num_heads=4) at small shapes.
    B, T = 2, 8
    embedding_dim, num_heads = 32, 4
    inner_dim = embedding_dim
    out_dim = embedding_dim

    key = jax.random.PRNGKey(0)
    kx, kq, kk, kv, kp = jax.random.split(key, 5)

    x = jax.random.normal(kx, (B, T, embedding_dim), dtype=jnp.float32)
    # torch.randn-style deterministic parameter init (synthetic, no checkpoint).
    wq = jax.random.normal(kq, (inner_dim, embedding_dim), dtype=jnp.float32)
    wk = jax.random.normal(kk, (inner_dim, embedding_dim), dtype=jnp.float32)
    wv = jax.random.normal(kv, (inner_dim, embedding_dim), dtype=jnp.float32)
    wp = jax.random.normal(kp, (out_dim, inner_dim), dtype=jnp.float32)

    ref = attention_block_ref(x, wq, wk, wv, wp, num_heads=num_heads)

    # f32 compute path: tight check against the PyTorch-equivalent reference.
    params_f32 = prepare_attention_weights(wq, wk, wv, wp, num_heads=num_heads,
                                           compute_dtype=jnp.float32)
    out_f32 = jax.block_until_ready(attention_block(x, params_f32))
    assert out_f32.shape == (B, T, out_dim)
    assert jnp.allclose(out_f32, ref, atol=5e-3, rtol=5e-3), \
        f"f32 max abs err = {jnp.max(jnp.abs(out_f32 - ref))}"

    # Default bf16 matmul path (f32 accumulation + f32 softmax in-kernel).
    params_bf16 = prepare_attention_weights(wq, wk, wv, wp, num_heads=num_heads)
    out_bf16 = jax.block_until_ready(attention_block(x, params_bf16))
    assert out_bf16.shape == (B, T, out_dim)
    assert jnp.allclose(out_bf16, ref, atol=7.5e-2, rtol=7.5e-2), \
        f"bf16 max abs err = {jnp.max(jnp.abs(out_bf16 - ref))}"

    print("KERNEL_OK")
</pallas_src>

<mosaic_0001>
module attributes {stable_mosaic.version = 11 : i64} {
  func.func @_mha_head_kernel(%arg0: i32, %arg1: i32, %arg2: memref<1x8x32xf32, #tpu.memory_space<vmem>>, %arg3: memref<1x3x32x8xf32, #tpu.memory_space<vmem>>, %arg4: memref<1x8x32xf32, #tpu.memory_space<vmem>>, %arg5: memref<1x8x32xf32, #tpu.memory_space<vmem>>, %arg6: memref<8x32xf32, #tpu.memory_space<vmem>>) attributes {dimension_semantics = [#tpu.dimension_semantics<parallel>, #tpu.dimension_semantics<arbitrary>], iteration_bounds = array<i64: 2, 4>, scalar_prefetch = 0 : i64, scratch_operands = 1 : i64, tpu.core_type = #tpu.core_type<tc>, window_params = [{transform_indices = @transform_0, window_bounds = array<i64: 1, 8, 32>}, {transform_indices = @transform_1, window_bounds = array<i64: 1, 3, 32, 8>}, {transform_indices = @transform_2, window_bounds = array<i64: 1, 8, 32>}, {transform_indices = @transform_3, window_bounds = array<i64: 1, 8, 32>}]} {
    %c0_i32 = arith.constant 0 : i32
    %0 = arith.cmpi eq, %arg1, %c0_i32 : i32
    %1 = arith.extui %0 : i1 to i32
    %c0_i32_0 = arith.constant 0 : i32
    %2 = arith.cmpi ne, %1, %c0_i32_0 : i32
    scf.if %2 {
      %cst_29 = arith.constant 0.000000e+00 : f32
      %40 = vector.broadcast %cst_29 : f32 to vector<8x32xf32>
      %c0_30 = arith.constant 0 : index
      %c0_31 = arith.constant 0 : index
      %41 = vector.load %arg6[%c0_30, %c0_31] : memref<8x32xf32, #tpu.memory_space<vmem>>, vector<8x32xf32>
      tpu.vector_store %arg6[%c0_30, %c0_31], %40 {strides = array<i32>} : memref<8x32xf32, #tpu.memory_space<vmem>>, vector<8x32xf32>,
    } else {
    }
    %c0 = arith.constant 0 : index
    %c0_1 = arith.constant 0 : index
    %c0_2 = arith.constant 0 : index
    %3 = vector.load %arg2[%c0, %c0_1, %c0_2] : memref<1x8x32xf32, #tpu.memory_space<vmem>>, vector<1x8x32xf32>
    %4 = vector.shape_cast %3 : vector<1x8x32xf32> to vector<8x32xf32>
    %c0_3 = arith.constant 0 : index
    %c0_4 = arith.constant 0 : index
    %c0_5 = arith.constant 0 : index
    %c0_6 = arith.constant 0 : index
    %5 = vector.load %arg3[%c0_3, %c0_4, %c0_5, %c0_6] : memref<1x3x32x8xf32, #tpu.memory_space<vmem>>, vector<1x1x32x8xf32>
    %6 = vector.shape_cast %5 : vector<1x1x32x8xf32> to vector<32x8xf32>
    %cst = arith.constant dense<0.000000e+00> : vector<8x8xf32>
    %7 = tpu.matmul %4, %6, %cst {dimension_numbers = #tpu.dot_dimension_numbers<[1], [0], [0], [1], [0, 0, 1, 1], [], []>} : vector<8x32xf32>, vector<32x8xf32>, vector<8x8xf32> -> vector<8x8xf32>
    %c0_7 = arith.constant 0 : index
    %c1 = arith.constant 1 : index
    %c0_8 = arith.constant 0 : index
    %c0_9 = arith.constant 0 : index
    %8 = vector.load %arg3[%c0_7, %c1, %c0_8, %c0_9] : memref<1x3x32x8xf32, #tpu.memory_space<vmem>>, vector<1x1x32x8xf32>
    %9 = vector.shape_cast %8 : vector<1x1x32x8xf32> to vector<32x8xf32>
    %cst_10 = arith.constant dense<0.000000e+00> : vector<8x8xf32>
    %10 = tpu.matmul %4, %9, %cst_10 {dimension_numbers = #tpu.dot_dimension_numbers<[1], [0], [0], [1], [0, 0, 1, 1], [], []>} : vector<8x32xf32>, vector<32x8xf32>, vector<8x8xf32> -> vector<8x8xf32>
    %c0_11 = arith.constant 0 : index
    %c2 = arith.constant 2 : index
    %c0_12 = arith.constant 0 : index
    %c0_13 = arith.constant 0 : index
    %11 = vector.load %arg3[%c0_11, %c2, %c0_12, %c0_13] : memref<1x3x32x8xf32, #tpu.memory_space<vmem>>, vector<1x1x32x8xf32>
    %12 = vector.shape_cast %11 : vector<1x1x32x8xf32> to vector<32x8xf32>
    %cst_14 = arith.constant dense<0.000000e+00> : vector<8x8xf32>
    %13 = tpu.matmul %4, %12, %cst_14 {dimension_numbers = #tpu.dot_dimension_numbers<[1], [0], [0], [1], [0, 0, 1, 1], [], []>} : vector<8x32xf32>, vector<32x8xf32>, vector<8x8xf32> -> vector<8x8xf32>
    %14 = vector.shape_cast %7 : vector<8x8xf32> to vector<1x8x8xf32>
    %15 = vector.shape_cast %10 : vector<8x8xf32> to vector<1x8x8xf32>
    %16 = vector.shape_cast %13 : vector<8x8xf32> to vector<1x8x8xf32>
    "tpu.trace_start"() <{level = 10 : i32, message = "bqd,bkd->bqk"}> : () -> ()
    %cst_15 = arith.constant dense<0.000000e+00> : vector<1x8x8xf32>
    %17 = tpu.matmul %14, %15, %cst_15 {dimension_numbers = #tpu.dot_dimension_numbers<[2], [2], [1], [1], [0, 0, 0, 1, 1, 1], [0], [0]>} : vector<1x8x8xf32>, vector<1x8x8xf32>, vector<1x8x8xf32> -> vector<1x8x8xf32>
    "tpu.trace_stop"() : () -> ()
    %cst_16 = arith.constant dense<0xFF800000> : vector<1x8xf32>
    %18 = vector.multi_reduction <maximumf>, %17, %cst_16 [2] : vector<1x8x8xf32> to vector<1x8xf32>
    %19 = vector.shape_cast %18 : vector<1x8xf32> to vector<1x8x1xf32>
    %20 = vector.broadcast %19 : vector<1x8x1xf32> to vector<1x8x8xf32>
    %21 = arith.subf %17, %20 : vector<1x8x8xf32>
    %22 = math.exp %21 : vector<1x8x8xf32>
    %cst_17 = arith.constant dense<0.000000e+00> : vector<1x8xf32>
    %23 = vector.multi_reduction <add>, %22, %cst_17 [2] : vector<1x8x8xf32> to vector<1x8xf32>
    %24 = vector.shape_cast %23 : vector<1x8xf32> to vector<1x8x1xf32>
    %cst_18 = arith.constant 1.000000e+00 : f32
    %25 = vector.broadcast %cst_18 : f32 to vector<1x8x1xf32>
    %26 = arith.divf %25, %24 : vector<1x8x1xf32>
    %27 = vector.broadcast %26 : vector<1x8x1xf32> to vector<1x8x8xf32>
    %28 = arith.mulf %22, %27 : vector<1x8x8xf32>
    "tpu.trace_start"() <{level = 10 : i32, message = "bqk,bkd->bqd"}> : () -> ()
    %cst_19 = arith.constant dense<0.000000e+00> : vector<1x8x8xf32>
    %29 = tpu.matmul %28, %16, %cst_19 {dimension_numbers = #tpu.dot_dimension_numbers<[2], [1], [1], [2], [0, 0, 0, 1, 1, 2], [0], [0]>} : vector<1x8x8xf32>, vector<1x8x8xf32>, vector<1x8x8xf32> -> vector<1x8x8xf32>
    "tpu.trace_stop"() : () -> ()
    %30 = vector.shape_cast %29 : vector<1x8x8xf32> to vector<8x8xf32>
    %c0_20 = arith.constant 0 : index
    %c0_21 = arith.constant 0 : index
    %31 = vector.load %arg6[%c0_20, %c0_21] : memref<8x32xf32, #tpu.memory_space<vmem>>, vector<8x32xf32>
    %c0_22 = arith.constant 0 : index
    %c0_23 = arith.constant 0 : index
    %c0_24 = arith.constant 0 : index
    %32 = vector.load %arg4[%c0_22, %c0_23, %c0_24] : memref<1x8x32xf32, #tpu.memory_space<vmem>>, vector<1x8x32xf32>
    %33 = vector.shape_cast %32 : vector<1x8x32xf32> to vector<8x32xf32>
    %cst_25 = arith.constant dense<0.000000e+00> : vector<8x32xf32>
    %34 = tpu.matmul %30, %33, %cst_25 {dimension_numbers = #tpu.dot_dimension_numbers<[1], [0], [0], [1], [0, 0, 1, 1], [], []>} : vector<8x8xf32>, vector<8x32xf32>, vector<8x32xf32> -> vector<8x32xf32>
    %35 = arith.addf %31, %34 : vector<8x32xf32>
    %c0_26 = arith.constant 0 : index
    %c0_27 = arith.constant 0 : index
    %36 = vector.load %arg6[%c0_26, %c0_27] : memref<8x32xf32, #tpu.memory_space<vmem>>, vector<8x32xf32>
    tpu.vector_store %arg6[%c0_26, %c0_27], %35 {strides = array<i32>} : memref<8x32xf32, #tpu.memory_space<vmem>>, vector<8x32xf32>,
    %c3_i32 = arith.constant 3 : i32
    %37 = arith.cmpi eq, %arg1, %c3_i32 : i32
    %38 = arith.extui %37 : i1 to i32
    %c0_i32_28 = arith.constant 0 : i32
    %39 = arith.cmpi ne, %38, %c0_i32_28 : i32
    scf.if %39 {
      %c0_29 = arith.constant 0 : index
      %c0_30 = arith.constant 0 : index
      %40 = vector.load %arg6[%c0_29, %c0_30] : memref<8x32xf32, #tpu.memory_space<vmem>>, vector<8x32xf32>
      %41 = vector.shape_cast %40 : vector<8x32xf32> to vector<1x8x32xf32>
      %c0_31 = arith.constant 0 : index
      %c0_32 = arith.constant 0 : index
      %c0_33 = arith.constant 0 : index
      %42 = vector.load %arg5[%c0_31, %c0_32, %c0_33] : memref<1x8x32xf32, #tpu.memory_space<vmem>>, vector<1x8x32xf32>
      tpu.vector_store %arg5[%c0_31, %c0_32, %c0_33], %41 {strides = array<i32>} : memref<1x8x32xf32, #tpu.memory_space<vmem>>, vector<1x8x32xf32>,
    } else {
    }
    return
  }
  func.func @transform_0(%arg0: i32, %arg1: i32) -> (i32, i32, i32) {
    %c0_i32 = arith.constant 0 : i32
    %c0_i32_0 = arith.constant 0 : i32
    %c0_i32_1 = arith.constant 0 : i32
    return %arg0, %c0_i32, %c0_i32_0 : i32, i32, i32
  }
  func.func @transform_1(%arg0: i32, %arg1: i32) -> (i32, i32, i32, i32) {
    %c0_i32 = arith.constant 0 : i32
    %c0_i32_0 = arith.constant 0 : i32
    %c0_i32_1 = arith.constant 0 : i32
    %c0_i32_2 = arith.constant 0 : i32
    return %arg1, %c0_i32, %c0_i32_0, %c0_i32_1 : i32, i32, i32, i32
  }
  func.func @transform_2(%arg0: i32, %arg1: i32) -> (i32, i32, i32) {
    %c0_i32 = arith.constant 0 : i32
    %c0_i32_0 = arith.constant 0 : i32
    %c0_i32_1 = arith.constant 0 : i32
    return %arg1, %c0_i32, %c0_i32_0 : i32, i32, i32
  }
  func.func @transform_3(%arg0: i32, %arg1: i32) -> (i32, i32, i32) {
    %c0_i32 = arith.constant 0 : i32
    %c0_i32_0 = arith.constant 0 : i32
    %c0_i32_1 = arith.constant 0 : i32
    return %arg0, %c0_i32, %c0_i32_0 : i32, i32, i32
  }
}

</mosaic_0001>

<bundles_post_ra>
// kernel: tpu_custom_call.1
= control target key start
LH: loop header
LB: loop body
LE: loop exit
PB: predicated region body
PF: predicated region fallthrough
CT: control target
= control target key end

     0   :  { %8 = vsyncpa [#allocation4], 0  ;;  %s908_s0 = inlined_call_operand.vmem [shape: f32[2,8,32], index: 0, kind: input, shape index: {}]   ;;  %s909_s1 = inlined_call_operand.vmem [shape: f32[4,3,32,8], index: 1, kind: input, shape index: {}]   ;;  %s910_s2 = inlined_call_operand.vmem [shape: f32[4,8,32], index: 2, kind: input, shape index: {}]   ;;  %s911_s3 = inlined_call_operand.hbm [shape: f32[2,8,32], index: 3, kind: output, shape index: {}]  }
   0x1   :  { %10 = vsyncpa [#allocation4 + $0x1], 0  ;;  %s742_s12 = smov 0   ;;  %s744_s13 = smov 0  }
   0x2   :  { %s746_s14 = smov 0   ;;  %s748_s15 = smov 0  }
   0x3   :  { %s750_s16 = smov 0   ;;  %s752_s17 = smov 0  }
   0x4   :  { %s754_s18 = smov 0   ;;  %s756_s19 = smov 0  }
   0x5 LB: > { %s518_s20 = sadd.s32 4294967295, %s719_s19   ;;  %s519_s21 = sadd.s32 4294967294, %s719_s19   ;;  %s719_s19 = sphi %s756_s19, %s16_s19   ;;  %s715_s18 = sphi %s754_s18, %s927_s18   ;;  %s711_s17 = sphi %s752_s17, %s926_s17   ;;  %s707_s16 = sphi %s750_s16, %s925_s16   ;;  %s703_s15 = sphi %s748_s15, %s924_s15   ;;  %s699_s14 = sphi %s746_s14, %s923_s14   ;;  %s695_s13 = sphi %s744_s13, %s922_s13   ;;  %s691_s12 = sphi %s742_s12, %s921_s12  }
   0x6   : > { %s25_s22 = sadd.s32 1, %s711_s17  ;;  %s28_s23 = sadd.s32 1, %s715_s18 }
   0x7   : > { %p26_p0 = scmp.ge.s32.totalorder %s25_s22, 4  ;;  %p123_p1 = scmp.ne.s32.totalorder %s699_s14, %s695_s13 }
   0x8   : > { %p124_p2 = scmp.eq.s32.totalorder %s518_s20, 7  ;;  %p129_p4 = scmp.ne.s32.totalorder %s695_s13, %s691_s12 }
   0x9   : > { %s929_s22 = smov (%p26_p0, %s25_s22), 0  ;;  %s931_s23 = smov (!%p26_p0, %s28_s23), %s715_s18 }
   0xa   : > { %914 = sst [smem:[#allocation6_spill]] %s929_s22  ;;  %p791_p3 = por %p124_p2, %p123_p1 }
   0xb   : > { %p30_p5 = scmp.ge.s32.totalorder %s931_s23, 2  ;;  %p130_p6 = scmp.eq.s32.totalorder %s519_s21, 7 }
   0xc   : > { %p522_p7 = scmp.ge.s32.totalorder %s719_s19, 1  ;;  %p170_p8 = scmp.lt.s32.totalorder %s719_s19, 9 }
   0xd   : > { %s933_s23 = smov (%p30_p5, %s931_s23), 0  ;;  %p801_p9 = por %p130_p6, %p129_p4 }
   0xe   : > { %916 = sst [smem:[#allocation7_spill]] %s933_s23  ;;  %p171_p10 = pnand %p522_p7, %p170_p8 }
   0xf   : > { %s110_s26 = ssub.s32 %s715_s18, %s933_s23  ;;  %s113_s27 = sadd.s32 1, %s699_s14 }
  0x10   : > { %p111_p11 = scmp.eq.s32.totalorder %s110_s26, 0  ;;  %174 = sbr.rel (%p171_p10) target bundleno = 847 (0x34f), region = 32 }
  0x11   : > { %s913_s29 = sand.u32 (!%p171_p10), 1, %s695_s13   ;;  %p202_p12 = scmp.lt.s32.totalorder (!%p171_p10), %s707_s16, 1 }
  0x12   : > { %s809_s28 = scalar_select %p111_p11, %s699_s14, %s113_s27  }
  0x13   : > { %s815_s30 = sshll.u32 (!%p171_p10), %s913_s29, 3  ;;  %p206_p13 = scmp.lt.s32.totalorder (!%p171_p10), %s703_s15, 3 }
  0x14   : > { %s201_s22 = scalar_lea.vmem (!%p171_p10), [#allocation3], %s815_s30  ;;  %p527_p0 = scmp.ne.s32.totalorder (!%p171_p10), %s703_s15, 0 }
  0x15   : > { %s203_s4 = scalar_select %p202_p12, %s707_s16, 1 }
  0x16   : > { %s207_s5 = scalar_select %p206_p13, %s703_s15, 3 }
  0x17   : > { %s524_s6 = sshll.u32 %s203_s4, 3  ;;  %218 = sbr.rel (%p527_p0) target bundleno = 30 (0x1e), region = 36 }
  0x18   : > { %s205_s9 = scalar_lea.vmem %s908_s0, %s524_s6  ;;  %s548_s10 = smul.u32 96, %s207_s5 }
  0x19   : > { %s526_s11 = sshll.u32 %s207_s5, 3 }
  0x1a   : > { %s826_s26 = scalar_lea.vmem %s909_s1, %s548_s10  ;;  %s831_s29 = scalar_lea.vmem %s910_s2, %s526_s11 }
  0x1c   : > { %vm219_vm0 = vcmask 261120   ;;  %v721_v0 = vmov 0.0  }
  0x1d   : > { %220 = vst.msk [vmem:[#allocation2] sm:$0xff] %vm219_vm0, %v721_v0 }
  0x1e PF: > { %v532_v1 = vld [vmem:[%s826_s26 + $0x38] sm:$0xff]  ;;  %v531_v2 = vld [vmem:[%s826_s26 + $0x30] sm:$0xff]  ;;  %v530_v5 = vld [vmem:[%s826_s26 + $0x28] sm:$0xff]  ;;  %vm226_vm1 = vcmask 261120   ;;  %vm300_vm2 = vcmask 64512   ;;  %p543_p1 = scmp.ne.s32.totalorder %s703_s15, 3 }
  0x1f   : > { %v225_v3 = vld [vmem:[%s826_s26 + $0x18] sm:$0xff]  ;;  %267 = vmatpush.msra.mxu1 %v532_v1  ;;  %v224_v4 = vld [vmem:[%s826_s26 + $0x10] sm:$0xff]  ;;  %v223_v6 = vld [vmem:[%s826_s26 + $0x8] sm:$0xff] }
  0x20   : > { %242 = vmatpush.msra.mxu0 %v225_v3  ;;  %v529_v7 = vld [vmem:[%s826_s26 + $0x20] sm:$0xff]  ;;  %v537_v14 = vld [vmem:[%s826_s26 + $0x58] sm:$0xff]  ;;  %v536_v15 = vld [vmem:[%s826_s26 + $0x50] sm:$0xff] }
  0x21   : > { %268 = vmatpush.msra.mxu1 %v531_v2  ;;  %v222_v8 = vld [vmem:[%s826_s26] sm:$0xff]  ;;  %292 = vmatpush.msra.mxu2 %v537_v14  ;;  %v535_v16 = vld [vmem:[%s826_s26 + $0x48] sm:$0xff] }
  0x22   : > { %243 = vmatpush.msra.mxu0 %v224_v4  ;;  %v221_v9 = vld [vmem:[%s205_s9] sm:$0xff] }
  0x23   : > { %269 = vmatpush.msra.mxu1 %v530_v5  ;;  %293 = vmatpush.msra.mxu2 %v536_v15  ;;  %v534_v17 = vld [vmem:[%s826_s26 + $0x40] sm:$0xff] }
  0x24   : > { %244 = vmatpush.msra.mxu0 %v223_v6  ;;  %v376_v24 = vld [vmem:[%s831_s29] sm:$0xff] }
  0x25   : > { %270 = vmatpush.msra.mxu1 %v529_v7  ;;  %294 = vmatpush.msra.mxu2 %v535_v16  ;;  %v375_v38 = vld [vmem:[#allocation2] sm:$0xff] }
  0x26   : > { %245 = vmatpush.msra.mxu0 %v222_v8  ;;  %533 = vmatmul.msk.f32.vlgmr.msra.gmra.mxu1 %vm226_vm1, %v221_v9 }
  0x27   : > { %528 = vmatmul.msk.f32.vlgmr.msra.gmra.mxu0 %vm226_vm1, %v221_v9  ;;  %295 = vmatpush.msra.mxu2 %v534_v17 }
  0x28   : > { %538 = vmatmul.msk.f32.vlgmr.msra.gmra.mxu2 %vm226_vm1, %v221_v9  ;;  %395 = vmatpush.msrb.mxu0 %v376_v24 }
  0xa3   : > { %v272_v10 = vpop.f32.mrf.mxu1 }
  0xa4   : > { %539 = vmatpush.xpose.msk.msra.mxu3 %vm300_vm2, %v272_v10  ;;  %v247_v11 = vpop.f32.mrf.mxu0 }
  0xa7   : > { %540 = vmatmul.msk.f32.vlgmr.msra.gmra.mxu3 %vm300_vm2, %v247_v11 }
  0xab   : > { %v297_v23 = vpop.f32.mrf.mxu2 }
  0xac   : > { %370 = vmatpush.msrb.mxu3 %v297_v23 }
 0x12a   : > { %v324_v12 = vpop.f32.mrf.mxu3 }
 0x12b   : > { %v327_v13 = vsel %vm300_vm2, %v324_v12, -inf }
 0x12c   : > { %328 = vmax.xlane.f32.xlu0 %v327_v13 }
 0x19f   : > { %v329_v18 = vpop.xlane.xlu0 %328 }
 0x1a0   : > { %v330_v19 = vsub.f32 %v324_v12, %v329_v18 }
 0x1a2   : > { %v331_v20 = vmul.f32 1.442695, %v330_v19 }
 0x1a4   : > { %621 = vpow2.f32 %v331_v20 }
 0x1aa   : > { %v622_v21 = vpop.eup %621 }
 0x1ab   : > { %v333_v22 = vsel %vm300_vm2, %v622_v21, 0.0 }
 0x1ac   : > { %334 = vadd.xlane.f32.xlu0 %v333_v22 }
 0x21f   : > { %v335_v25 = vpop.xlane.xlu0 %334 }
 0x220   : > { %623 = vrcp.f32 %v335_v25  ;;  %v347_v29 = vand.u32 2147483648, %v335_v25  ;;  %v345_v31 = vand.u32 2147483647, %v335_v25  ;;  %vm341_vm4 = vweird.f32 %v335_v25 }
 0x222   : > { %v348_v33 = vor.u32 1.1754944e-38, %v347_v29  ;;  %vm346_vm6 = vcmp.eq.f32.partialorder %v345_v31, 8.507059e+37 }
 0x226   : > { %v624_v26 = vpop.eup %623 }
 0x227   : > { %v337_v27 = vmul.f32 %v624_v26, %v335_v25  ;;  %vm342_vm3 = vweird.f32 %v624_v26 }
 0x228   : > { %vm343_vm5 = vmor %vm341_vm4, %vm342_vm3 }
 0x229   : > { %v338_v28 = vsub.f32 1.0, %v337_v27 }
 0x22b   : > { %v339_v30 = vmul.f32 %v624_v26, %v338_v28 }
 0x22d   : > { %v340_v32 = vadd.f32 %v624_v26, %v339_v30 }
 0x22f   : > { %v344_v34 = vsel %vm343_vm5, %v624_v26, %v340_v32 }
 0x230   : > { %v349_v35 = vsel %vm346_vm6, %v348_v33, %v344_v34 }
 0x231   : > { %v351_v36 = vmul.f32 %v622_v21, %v349_v35 }
 0x233   : > { %541 = vmatmul.msk.f32.vlgmr.msrb.gmra.mxu3 %vm300_vm2, %v351_v36 }
 0x2b6   : > { %v372_v37 = vpop.f32.mrf.mxu3 }
 0x2b7   : > { %542 = vmatmul.msk.f32.vlgmr.msrb.gmra.mxu0 %vm300_vm2, %v372_v37 }
 0x333   : > { %405 = sbr.rel (%p543_p1) target bundleno = 832 (0x340), region = 40 }
 0x334   : > { %v397_v39 = vpop.f32.mrf.mxu0 }
 0x335   : > { %v400_v40 = vadd.f32 %v397_v39, %v375_v38 }
 0x337   : > { %401 = vst.msk [vmem:[#allocation2] sm:$0xff] %vm226_vm1, %v400_v40 }
 0x33e   : > { %v406_v41 = vld [vmem:[#allocation2] sm:$0xff] }
 0x33f   : > { %407 = vst.msk [vmem:[%s201_s22] sm:$0xff] %vm226_vm1, %v406_v41 }
 0x340 PF: > { %s545_s23 = sshll.u32 %s707_s16, 3  ;;  %s421_s6 = sshll.u32 %s201_s22, 4  ;;  %s422_s6 = int_to_ptr.vmem [resolvable:$true] %s421_s6 }
 0x341   : > { %s419_s5 = scalar_lea.hbm %s911_s3, %s545_s23  ;;  %s918_s7 = sand.u32 1, %s695_s13  }
 0x342   : > { %s423_s15 = sshll.u32 %s419_s5, 4  ;;  %s409_s8 = scalar_lea.sflag [#allocation4], %s918_s7  ;;  %s424_s15 = int_to_ptr.hbm [resolvable:$true] %s423_s15 }
 0x343   : > { %s639_s9 = sshra.s32 %s424_s15, 4  ;;  %s645_s20 = scalar_lea.hbm %s911_s3, 16  ;;  %s640_s9 = int_to_ptr.hbm [resolvable:$true] %s639_s9 }
 0x344   : > { %s641_s10 = scalar_lea.hbm %s640_s9, 8  ;;  %p646_p6 = scmp.lt.s32.totalorder %s640_s9, %s911_s3 }
 0x345   : > { %p642_p2 = scmp.ne.s32.totalorder %s640_s9, %s641_s10  ;;  %p647_p7 = scmp.lt.s32.totalorder %s645_s20, %s641_s10 }
 0x347   : > { %p643_p4 = pnand %p642_p2, %p791_p3  ;;  %p648_p8 = por %p647_p7, %p646_p6 }
 0x349   : > { %p644_p5 = pneg %p643_p4 }
 0x34b   : > { %p649_p10 = pnand %p648_p8, %p644_p5 }
 0x34d   : > { %652 = shalt.err (!%p649_p10)
}
 0x34e   : > { %549 = dma.vmem_to_hbm [thread:$0]  (%p791_p3), %s422_s6, 128, %s424_s15, %s409_s8  }
 0x34f PF: > { %p555_p11 = scmp.ge.s32.totalorder %s719_s19, 2  ;;  %s435_s22 = sand.u32 1, %s691_s12  }
 0x350   : > { %s436_s30 = scalar_lea.sflag [#allocation4], %s435_s22 }
 0x351   : > { %p552_p12 = pnand %p555_p11, %p801_p9 }
 0x353   : > { %p553_p13 = pneg %p552_p12 }
 0x355   : > { %686 = dma.done.wait (%p553_p13), %s436_s30, 128  }
 0x356   : > { %688 = vsyncadd (%p553_p13), %s436_s30, 4294967168  ;;  %s16_s19 = sadd.s32 1, %s719_s19   ;;  %s919_s24 = sld [smem:[#allocation6_spill]] }
 0x357   : > { %p13_p0 = scmp.ge.s32.totalorder %s16_s19, 10   ;;  %s920_s27 = sld [smem:[#allocation7_spill]] }
 0x358   : > { %s921_s12 = smov %s695_s13  ;;  %s922_s13 = smov %s699_s14 }
 0x359   : > { %s923_s14 = smov %s809_s28  ;;  %s924_s15 = smov %s711_s17 }
 0x35a   : > { %s925_s16 = smov %s715_s18  ;;  %15 = sbr.rel (!%p13_p0) target bundleno = 5 (0x5), region = 83 }
 0x35c   : > { %s926_s17 = smov %s919_s24 }
 0x35d   : > { %s927_s18 = smov %s920_s27 }
 0x35f   :  { %442 = vsyncpa [#allocation4], 1 }
 0x360   :  { %444 = vsyncpa [#allocation4 + $0x1], 1 }

</bundles_post_ra>
